<compile_context>
chip_gen: v6e
topology: v6e:2x2x1
jax: 0.10.0
libtpu: 0.0.40
codegen_flags: <defaults>
</compile_context>

<pallas_src>
import jax
import jax.numpy as jnp
import numpy as np
from jax import lax
from jax.experimental import pallas as pl
from jax.experimental.pallas import tpu as pltpu

DELTA = 0.7
GAMMA = 2.0        # fixed at 2.0 -> squared explicitly on the VPU (no pow -> EUP)
EPSILON = 1e-07
LANES = 128
MAX_TILE_ROWS = 512   # 2 inputs x 2 buffers x (2ch, 512, 128) f32 ~= 2 MiB VMEM


def _make_kernel(tile_rows, tiles_per_chunk, rows, needs_row_mask, fold_to_8):
    """Grid = (N, n_chunks, tiles_per_chunk); axis 2 is the reduction axis."""

    def kernel(pred_ref, true_ref, out_ref, acc_ref):
        # pred/true blocks: (2, tile_rows, 128)   (batch dim squeezed via None)
        # out block:        (8, 128)              (batch & chunk dims squeezed)
        s = pl.program_id(2)

        @pl.when(s == 0)
        def _():
            acc_ref[...] = jnp.zeros(acc_ref.shape, jnp.float32)

        p0 = jnp.clip(pred_ref[0].astype(jnp.float32), EPSILON, 1.0 - EPSILON)
        p1 = jnp.clip(pred_ref[1].astype(jnp.float32), EPSILON, 1.0 - EPSILON)
        t0 = true_ref[0].astype(jnp.float32)
        t1 = true_ref[1].astype(jnp.float32)

        # class weights and the CE minus sign folded into constants:
        #   (delta-1) * t0 * log(p0) == (1-delta) * (-t0 * log p0)
        wce0 = (DELTA - 1.0) * (t0 * jnp.log(p0))
        wce1 = (-DELTA) * (t1 * jnp.log(p1))
        pm0 = 1.0 - p0
        pm1 = 1.0 - p1
        loss = pm0 * pm0 * wce0 + pm1 * pm1 * wce1     # (tile_rows, 128)

        if needs_row_mask:
            # last global row-tile extends past `rows`; OOB rows hold garbage.
            g = pl.program_id(1) * tiles_per_chunk + s        # global tile index
            ridx = g * tile_rows + lax.broadcasted_iota(jnp.int32, loss.shape, 0)
            loss = jnp.where(ridx < rows, loss, 0.0)

        if fold_to_8:
            # fold to a single (8,128) vreg strip: pure full-vreg VALU adds,
            # no cross-lane traffic, tiny accumulator.
            loss = loss.reshape(tile_rows // 8, 8, LANES).sum(axis=0)
        acc_ref[...] += loss

        @pl.when(s == tiles_per_chunk - 1)
        def _():
            total = jnp.sum(acc_ref[...])   # one cross-lane reduce per (n, chunk)
            # full-tile unmasked vst; wrapper reads element [0, 0] (exact, no
            # pre-scale / re-sum rounding).
            out_ref[...] = jnp.full(out_ref.shape, total, jnp.float32)

    return kernel


def symmetric_focal_loss(y_pred, y_true):
    """y_pred, y_true: [N, C, H, W] (probabilities / one-hot). Returns scalar f32."""
    N, C, H, W = y_pred.shape
    assert y_true.shape == y_pred.shape
    assert C >= 2, "SymmetricFocalLoss uses channels 0 (background) and 1 (foreground)"
    HW = H * W

    if HW % LANES == 0:
        rows = HW // LANES
        p = y_pred.reshape(N, C, rows, LANES)   # free reshape, no HBM copy
        t = y_true.reshape(N, C, rows, LANES)
    else:
        # Pad only the 2 channels the kernel reads (slice+pad fuse into one pass).
        # The zero-padded tail contributes exactly 0 (y_true == 0 there).
        hw_pad = pl.cdiv(HW, LANES) * LANES
        rows = hw_pad // LANES
        pad = ((0, 0), (0, 0), (0, hw_pad - HW))
        p = jnp.pad(y_pred[:, :2].reshape(N, 2, HW), pad).reshape(N, 2, rows, LANES)
        t = jnp.pad(y_true[:, :2].reshape(N, 2, HW), pad).reshape(N, 2, rows, LANES)
        # TODO(synk): a fully pad-free ragged-HW path would mask the flat tail
        # in-kernel; kept as a 2-channel-only wrapper pad here.

    # Fixed tiling: never fall back to an arbitrarily large whole-`rows` block.
    tile_rows = rows if rows <= MAX_TILE_ROWS else MAX_TILE_ROWS
    n_row_tiles = pl.cdiv(rows, tile_rows)
    needs_row_mask = (rows % tile_rows) != 0           # ragged last tile -> mask
    fold_to_8 = (tile_rows % 8) == 0
    acc_rows = 8 if fold_to_8 else tile_rows

    # Spatial "parallel" chunk axis: keeps both v7x TensorCores busy at small N.
    n_chunks = 2 if (n_row_tiles >= 2 and n_row_tiles % 2 == 0) else 1
    tiles_per_chunk = n_row_tiles // n_chunks

    kernel = _make_kernel(tile_rows, tiles_per_chunk, rows, needs_row_mask, fold_to_8)

    def _in_map(n, c, s):
        # channel block index 0 of size 2 -> only channels 0..1 are DMA'd
        return (n, 0, c * tiles_per_chunk + s, 0)

    partials = pl.pallas_call(
        kernel,
        out_shape=jax.ShapeDtypeStruct((N, n_chunks, 8, LANES), jnp.float32),
        grid=(N, n_chunks, tiles_per_chunk),
        in_specs=[
            pl.BlockSpec((None, 2, tile_rows, LANES), _in_map),
            pl.BlockSpec((None, 2, tile_rows, LANES), _in_map),
        ],
        out_specs=pl.BlockSpec((None, None, 8, LANES), lambda n, c, s: (n, c, 0, 0)),
        scratch_shapes=[pltpu.VMEM((acc_rows, LANES), jnp.float32)],
        compiler_params=pltpu.CompilerParams(
            dimension_semantics=("parallel", "parallel", "arbitrary"),
        ),
    )(p, t)

    # per-(batch, chunk) partial sums; mean over N*H*W pixels (matches torch.mean)
    return jnp.sum(partials[:, :, 0, 0]) / jnp.float32(N * H * W)


def _reference(y_pred, y_true):
    p = jnp.clip(y_pred.astype(jnp.float32), EPSILON, 1.0 - EPSILON)
    t = y_true.astype(jnp.float32)
    ce = -t * jnp.log(p)
    back = (1.0 - DELTA) * jnp.power(1.0 - p[:, 0], GAMMA) * ce[:, 0]
    fore = DELTA * jnp.power(1.0 - p[:, 1], GAMMA) * ce[:, 1]
    return jnp.mean(back + fore)


def _check(shape, dtype, key, rtol, atol=1e-6):
    N, C, H, W = shape
    k1, k2 = jax.random.split(key)
    logits = jax.random.normal(k1, shape, dtype=jnp.float32)
    y_pred = jax.nn.softmax(logits, axis=1).astype(dtype)          # probabilities
    labels = jax.random.randint(k2, (N, H, W), 0, C)
    y_true = jax.nn.one_hot(labels, C, axis=1, dtype=dtype)        # one-hot NCHW
    loss = jax.block_until_ready(symmetric_focal_loss(y_pred, y_true))
    ref = jax.block_until_ready(_reference(y_pred, y_true))
    np.testing.assert_allclose(np.asarray(loss), np.asarray(ref), rtol=rtol, atol=atol)


if __name__ == "__main__":
    keys = jax.random.split(jax.random.PRNGKey(0), 3)

    # Main case: small NCHW probability / one-hot inputs (module's expected use).
    _check((2, 4, 16, 16), jnp.float32, keys[0], rtol=1e-5)
    # Narrow-dtype streaming (bf16 in, f32 math in-kernel) + folded accumulator path.
    _check((2, 4, 64, 64), jnp.bfloat16, keys[1], rtol=1e-4)
    # Ragged HW (pad of 2 channels only) + multi-tile reduction, chunking and
    # in-kernel masking of the partial last row-tile.
    _check((1, 2, 260, 260), jnp.float32, keys[2], rtol=1e-4)

    print("KERNEL_OK")
</pallas_src>

<mosaic_0001>
module attributes {stable_mosaic.version = 11 : i64} {
  func.func @kernel(%arg0: i32, %arg1: i32, %arg2: i32, %arg3: memref<1x2x2x128xf32, #tpu.memory_space<vmem>>, %arg4: memref<1x2x2x128xf32, #tpu.memory_space<vmem>>, %arg5: memref<1x1x8x128xf32, #tpu.memory_space<vmem>>, %arg6: memref<2x128xf32, #tpu.memory_space<vmem>>) attributes {dimension_semantics = [#tpu.dimension_semantics<parallel>, #tpu.dimension_semantics<parallel>, #tpu.dimension_semantics<arbitrary>], iteration_bounds = array<i64: 2, 1, 1>, scalar_prefetch = 0 : i64, scratch_operands = 1 : i64, tpu.core_type = #tpu.core_type<tc>, window_params = [{transform_indices = @transform_0, window_bounds = array<i64: 1, 2, 2, 128>}, {transform_indices = @transform_1, window_bounds = array<i64: 1, 2, 2, 128>}, {transform_indices = @transform_2, window_bounds = array<i64: 1, 1, 8, 128>}]} {
    %c0_i32 = arith.constant 0 : i32
    %0 = arith.cmpi eq, %arg2, %c0_i32 : i32
    %1 = arith.extui %0 : i1 to i32
    %c0_i32_0 = arith.constant 0 : i32
    %2 = arith.cmpi ne, %1, %c0_i32_0 : i32
    scf.if %2 {
      %cst_28 = arith.constant 0.000000e+00 : f32
      %42 = vector.broadcast %cst_28 : f32 to vector<2x128xf32>
      %c0_29 = arith.constant 0 : index
      %c0_30 = arith.constant 0 : index
      %43 = vector.load %arg6[%c0_29, %c0_30] : memref<2x128xf32, #tpu.memory_space<vmem>>, vector<2x128xf32>
      tpu.vector_store %arg6[%c0_29, %c0_30], %42 {strides = array<i32>} : memref<2x128xf32, #tpu.memory_space<vmem>>, vector<2x128xf32>,
    } else {
    }
    %c0 = arith.constant 0 : index
    %c0_1 = arith.constant 0 : index
    %c0_2 = arith.constant 0 : index
    %c0_3 = arith.constant 0 : index
    %3 = vector.load %arg3[%c0, %c0_1, %c0_2, %c0_3] : memref<1x2x2x128xf32, #tpu.memory_space<vmem>>, vector<1x1x2x128xf32>
    %4 = vector.shape_cast %3 : vector<1x1x2x128xf32> to vector<2x128xf32>
    %cst = arith.constant 1.000000e-07 : f32
    %cst_4 = arith.constant 0.99999988 : f32
    %5 = vector.broadcast %cst : f32 to vector<2x128xf32>
    %6 = arith.maximumf %5, %4 : vector<2x128xf32>
    %7 = vector.broadcast %cst_4 : f32 to vector<2x128xf32>
    %8 = arith.minimumf %7, %6 : vector<2x128xf32>
    %c0_5 = arith.constant 0 : index
    %c1 = arith.constant 1 : index
    %c0_6 = arith.constant 0 : index
    %c0_7 = arith.constant 0 : index
    %9 = vector.load %arg3[%c0_5, %c1, %c0_6, %c0_7] : memref<1x2x2x128xf32, #tpu.memory_space<vmem>>, vector<1x1x2x128xf32>
    %10 = vector.shape_cast %9 : vector<1x1x2x128xf32> to vector<2x128xf32>
    %cst_8 = arith.constant 1.000000e-07 : f32
    %cst_9 = arith.constant 0.99999988 : f32
    %11 = vector.broadcast %cst_8 : f32 to vector<2x128xf32>
    %12 = arith.maximumf %11, %10 : vector<2x128xf32>
    %13 = vector.broadcast %cst_9 : f32 to vector<2x128xf32>
    %14 = arith.minimumf %13, %12 : vector<2x128xf32>
    %c0_10 = arith.constant 0 : index
    %c0_11 = arith.constant 0 : index
    %c0_12 = arith.constant 0 : index
    %c0_13 = arith.constant 0 : index
    %15 = vector.load %arg4[%c0_10, %c0_11, %c0_12, %c0_13] : memref<1x2x2x128xf32, #tpu.memory_space<vmem>>, vector<1x1x2x128xf32>
    %16 = vector.shape_cast %15 : vector<1x1x2x128xf32> to vector<2x128xf32>
    %c0_14 = arith.constant 0 : index
    %c1_15 = arith.constant 1 : index
    %c0_16 = arith.constant 0 : index
    %c0_17 = arith.constant 0 : index
    %17 = vector.load %arg4[%c0_14, %c1_15, %c0_16, %c0_17] : memref<1x2x2x128xf32, #tpu.memory_space<vmem>>, vector<1x1x2x128xf32>
    %18 = vector.shape_cast %17 : vector<1x1x2x128xf32> to vector<2x128xf32>
    %19 = math.log %8 : vector<2x128xf32>
    %20 = arith.mulf %16, %19 : vector<2x128xf32>
    %cst_18 = arith.constant -3.000000e-01 : f32
    %21 = vector.broadcast %cst_18 : f32 to vector<2x128xf32>
    %22 = arith.mulf %21, %20 : vector<2x128xf32>
    %23 = math.log %14 : vector<2x128xf32>
    %24 = arith.mulf %18, %23 : vector<2x128xf32>
    %cst_19 = arith.constant -0.699999988 : f32
    %25 = vector.broadcast %cst_19 : f32 to vector<2x128xf32>
    %26 = arith.mulf %25, %24 : vector<2x128xf32>
    %cst_20 = arith.constant 1.000000e+00 : f32
    %27 = vector.broadcast %cst_20 : f32 to vector<2x128xf32>
    %28 = arith.subf %27, %8 : vector<2x128xf32>
    %cst_21 = arith.constant 1.000000e+00 : f32
    %29 = vector.broadcast %cst_21 : f32 to vector<2x128xf32>
    %30 = arith.subf %29, %14 : vector<2x128xf32>
    %31 = arith.mulf %28, %28 : vector<2x128xf32>
    %32 = arith.mulf %31, %22 : vector<2x128xf32>
    %33 = arith.mulf %30, %30 : vector<2x128xf32>
    %34 = arith.mulf %33, %26 : vector<2x128xf32>
    %35 = arith.addf %32, %34 : vector<2x128xf32>
    %c0_22 = arith.constant 0 : index
    %c0_23 = arith.constant 0 : index
    %36 = vector.load %arg6[%c0_22, %c0_23] : memref<2x128xf32, #tpu.memory_space<vmem>>, vector<2x128xf32>
    %37 = arith.addf %36, %35 : vector<2x128xf32>
    %c0_24 = arith.constant 0 : index
    %c0_25 = arith.constant 0 : index
    %38 = vector.load %arg6[%c0_24, %c0_25] : memref<2x128xf32, #tpu.memory_space<vmem>>, vector<2x128xf32>
    tpu.vector_store %arg6[%c0_24, %c0_25], %37 {strides = array<i32>} : memref<2x128xf32, #tpu.memory_space<vmem>>, vector<2x128xf32>,
    %c0_i32_26 = arith.constant 0 : i32
    %39 = arith.cmpi eq, %arg2, %c0_i32_26 : i32
    %40 = arith.extui %39 : i1 to i32
    %c0_i32_27 = arith.constant 0 : i32
    %41 = arith.cmpi ne, %40, %c0_i32_27 : i32
    scf.if %41 {
      %c0_28 = arith.constant 0 : index
      %c0_29 = arith.constant 0 : index
      %42 = vector.load %arg6[%c0_28, %c0_29] : memref<2x128xf32, #tpu.memory_space<vmem>>, vector<2x128xf32>
      %43 = vector.shape_cast %42 : vector<2x128xf32> to vector<1x2x128xf32>
      %cst_30 = arith.constant dense<0.000000e+00> : vector<1xf32>
      %44 = vector.multi_reduction <add>, %43, %cst_30 [1, 2] : vector<1x2x128xf32> to vector<1xf32>
      %45 = vector.shape_cast %44 : vector<1xf32> to vector<1x1x1xf32>
      %46 = vector.extract %45[0, 0, 0] : f32 from vector<1x1x1xf32>
      %47 = vector.broadcast %46 : f32 to vector<8x128xf32>
      %c0_31 = arith.constant 0 : index
      %c0_32 = arith.constant 0 : index
      %c0_33 = arith.constant 0 : index
      %c0_34 = arith.constant 0 : index
      %48 = vector.load %arg5[%c0_31, %c0_32, %c0_33, %c0_34] : memref<1x1x8x128xf32, #tpu.memory_space<vmem>>, vector<1x1x8x128xf32>
      %49 = vector.shape_cast %48 : vector<1x1x8x128xf32> to vector<8x128xf32>
      %50 = vector.shape_cast %47 : vector<8x128xf32> to vector<1x1x8x128xf32>
      tpu.vector_store %arg5[%c0_31, %c0_32, %c0_33, %c0_34], %50 {strides = array<i32>} : memref<1x1x8x128xf32, #tpu.memory_space<vmem>>, vector<1x1x8x128xf32>,
    } else {
    }
    return
  }
  func.func @transform_0(%arg0: i32, %arg1: i32, %arg2: i32) -> (i32, i32, i32, i32) {
    %c1_i32 = arith.constant 1 : i32
    %0 = arith.muli %arg1, %c1_i32 : i32
    %1 = arith.addi %0, %arg2 : i32
    %c0_i32 = arith.constant 0 : i32
    %c0_i32_0 = arith.constant 0 : i32
    %c0_i32_1 = arith.constant 0 : i32
    return %arg0, %c0_i32, %1, %c0_i32_0 : i32, i32, i32, i32
  }
  func.func @transform_1(%arg0: i32, %arg1: i32, %arg2: i32) -> (i32, i32, i32, i32) {
    %c1_i32 = arith.constant 1 : i32
    %0 = arith.muli %arg1, %c1_i32 : i32
    %1 = arith.addi %0, %arg2 : i32
    %c0_i32 = arith.constant 0 : i32
    %c0_i32_0 = arith.constant 0 : i32
    %c0_i32_1 = arith.constant 0 : i32
    return %arg0, %c0_i32, %1, %c0_i32_0 : i32, i32, i32, i32
  }
  func.func @transform_2(%arg0: i32, %arg1: i32, %arg2: i32) -> (i32, i32, i32, i32) {
    %c0_i32 = arith.constant 0 : i32
    %c0_i32_0 = arith.constant 0 : i32
    %c0_i32_1 = arith.constant 0 : i32
    return %arg0, %arg1, %c0_i32, %c0_i32_0 : i32, i32, i32, i32
  }
}

</mosaic_0001>

<bundles_post_ra>
// kernel: tpu_custom_call.1
= control target key start
LH: loop header
LB: loop body
LE: loop exit
PB: predicated region body
PF: predicated region fallthrough
CT: control target
= control target key end

     0   :  { %7 = vsyncpa [#allocation4], 0  ;;  %s848_s0 = inlined_call_operand.hbm [shape: f32[2,4,2,128], index: 0, kind: input, shape index: {}]   ;;  %s849_s1 = inlined_call_operand.hbm [shape: f32[2,4,2,128], index: 1, kind: input, shape index: {}]   ;;  %s850_s2 = inlined_call_operand.hbm [shape: f32[2,1,8,128], index: 2, kind: output, shape index: {}]  }
   0x1   :  { %9 = vsyncpa [#allocation4 + $0x1], 0 }
   0x2   :  { %10 = vsyncpa [#allocation7], 0 }
   0x3   :  { %12 = vsyncpa [#allocation7 + $0x1], 0 }
   0x4   :  { %13 = vsyncpa [#allocation5], 0 }
   0x5   :  { %15 = vsyncpa [#allocation5 + $0x1], 0  ;;  %s674_s9 = smov 0   ;;  %s676_s10 = smov 0  }
   0x6   :  { %s678_s11 = smov 0   ;;  %s680_s12 = smov 0  }
   0x7   :  { %s682_s13 = smov 0   ;;  %s684_s14 = smov 0  }
   0x8 LB: > { %s413_s15 = sadd.s32 4294967295, %s651_s14   ;;  %s414_s16 = sadd.s32 4294967294, %s651_s14   ;;  %s651_s14 = sphi %s684_s14, %s21_s14   ;;  %s647_s13 = sphi %s682_s13, %s862_s13   ;;  %s643_s12 = sphi %s680_s12, %s861_s12   ;;  %s639_s11 = sphi %s678_s11, %s860_s11   ;;  %s635_s10 = sphi %s676_s10, %s859_s10   ;;  %s631_s9 = sphi %s674_s9, %s858_s9  }
   0x9   : > { %s40_s17 = sadd.s32 1, %s647_s13  ;;  %s51_s18 = sadd.s32 1, %s639_s11 }
   0xa   : > { %p42_p0 = scmp.ge.s32.totalorder %s40_s17, 2  ;;  %p58_p1 = scmp.ne.s32.totalorder %s639_s11, %s635_s10 }
   0xb   : > { %p59_p2 = scmp.eq.s32.totalorder %s651_s14, 0  ;;  %p64_p3 = scmp.ne.s32.totalorder %s635_s10, %s631_s9 }
   0xc   : > { %s864_s17 = smov (%p42_p0, %s40_s17), 0  ;;  %p65_p5 = scmp.eq.s32.totalorder %s413_s15, 0 }
   0xd   : > { %p715_p4 = por %p59_p2, %p58_p1  ;;  %s46_s20 = ssub.s32 %s647_s13, %s864_s17 }
   0xe   : > { %p120_p6 = scmp.eq.s32.totalorder %s413_s15, 1  ;;  %p49_p7 = scmp.eq.s32.totalorder %s46_s20, 0 }
   0xf   : > { %p721_p8 = por %p65_p5, %p64_p3  ;;  %p126_p10 = scmp.eq.s32.totalorder %s414_s16, 1 }
  0x10   : > { %p725_p9 = por %p120_p6, %p58_p1  ;;  %p454_p13 = scmp.lt.s32.totalorder %s651_s14, 2 }
  0x11   : > { %s730_s23 = scalar_select %p49_p7, %s639_s11, %s51_s18  }
  0x12   : > { %p732_p11 = por %p126_p10, %p64_p3  ;;  %s739_s25 = sand.u32 1, %s639_s11  }
  0x13   : > { %s417_s26 = sshll.u32 %s739_s25, 2  ;;  %s433_s27 = sshll.u32 %s647_s13, 7 }
  0x14   : > { %s158_s30 = scalar_lea.hbm %s848_s0, %s433_s27  ;;  %s150_s3 = scalar_lea.vmem [#allocation3], %s417_s26 }
  0x15   : > { %s159_s4 = sshll.u32 %s150_s3, 4  ;;  %p752_p0 = pnand %p454_p13, %p715_p4  ;;  %s160_s4 = int_to_ptr.vmem [resolvable:$true] %s159_s4 }
  0x16   : > { %p423_p1 = scmp.ge.s32.totalorder %s651_s14, 1  ;;  %s147_s6 = scalar_lea.sflag [#allocation4], %s739_s25 }
  0x17   : > { %p513_p2 = pneg %p752_p0  ;;  %s524_s7 = scalar_lea.vmem %s160_s4, 64 }
  0x18   : > { %p525_p3 = scmp.ne.s32.totalorder %s160_s4, %s524_s7  ;;  %s653_s8 = smov [#allocation3]  }
  0x19   : > { %s529_s15 = sshll.u32 %s653_s8, 4  ;;  %s530_s15 = int_to_ptr.vmem [resolvable:$false] %s529_s15 }
  0x1a   : > { %p527_p5 = pnand %p525_p3, %p513_p2  ;;  %s531_s16 = scalar_lea.vmem %s530_s15, 128 }
  0x1b   : > { %p532_p4 = scmp.lt.s32.totalorder %s160_s4, %s530_s15  ;;  %p533_p7 = scmp.lt.s32.totalorder %s531_s16, %s524_s7 }
  0x1c   : > { %p528_p6 = pneg %p527_p5 }
  0x1d   : > { %p534_p10 = por %p533_p7, %p532_p4 }
  0x1f   : > { %p535_p13 = pnand %p534_p10, %p528_p6 }
  0x21   : > { %538 = shalt.err (!%p535_p13)
}
  0x22   : > { %s654_s18 = smov 32   ;;  %s655_s19 = smov 2  }
  0x23   : > { %446 = dma.hbm_to_vmem [thread:$0]  (!%p752_p0), %s158_s30, 64, %s160_s4, %s147_s6, %s654_s18, %s654_s18, %s655_s19  }
  0x24   : > { %p190_p3 = scmp.lt.s32.totalorder %s651_s14, 3  ;;  %s181_s29 = scalar_lea.hbm %s849_s1, %s433_s27 }
  0x25   : > { %s173_s7 = scalar_lea.vmem [#allocation6], %s417_s26  ;;  %s170_s15 = scalar_lea.sflag [#allocation7], %s739_s25 }
  0x26   : > { %p773_p5 = pnand %p423_p1, %p190_p3  ;;  %s182_s8 = sshll.u32 %s173_s7, 4  ;;  %s183_s8 = int_to_ptr.vmem [resolvable:$true] %s182_s8 }
  0x27   : > { %s552_s16 = scalar_lea.vmem %s183_s8, 64  ;;  %s656_s30 = smov [#allocation6]  }
  0x28   : > { %p553_p6 = scmp.ne.s32.totalorder %s183_s8, %s552_s16  ;;  %s557_s4 = sshll.u32 %s656_s30, 4  ;;  %s558_s4 = int_to_ptr.vmem [resolvable:$false] %s557_s4 }
  0x29   : > { %s559_s27 = scalar_lea.vmem %s558_s4, 128  ;;  %p560_p10 = scmp.lt.s32.totalorder %s183_s8, %s558_s4 }
  0x2a   : > { %p555_p4 = pnand %p553_p6, %p513_p2  ;;  %p561_p1 = scmp.lt.s32.totalorder %s559_s27, %s552_s16 }
  0x2c   : > { %p556_p7 = pneg %p555_p4  ;;  %p562_p13 = por %p561_p1, %p560_p10 }
  0x2e   : > { %p563_p3 = pnand %p562_p13, %p556_p7 }
  0x30   : > { %566 = shalt.err (!%p563_p3)
}
  0x31   : > { %449 = dma.hbm_to_vmem [thread:$0]  (!%p752_p0), %s181_s29, 64, %s183_s8, %s170_s15, %s654_s18, %s654_s18, %s655_s19  }
  0x32   : > { %194 = sbr.rel (%p773_p5) target bundleno = 313 (0x139), region = 28  ;;  %s788_s25 = sand.u32 (!%p773_p5), 1, %s635_s10  }
  0x33   : > { %s424_s26 = sshll.u32 (!%p773_p5), %s788_s25, 2  ;;  %s197_s6 = scalar_lea.sflag (!%p773_p5), [#allocation4], %s788_s25 }
  0x34   : > { %s200_s20 = scalar_lea.vmem (!%p773_p5), [#allocation3], %s424_s26 }
  0x37   : > { %618 = dma.done.wait (%p721_p8), %s197_s6, 64  }
  0x38   : > { %620 = vsyncadd (%p721_p8), %s197_s6, 4294967232  ;;  %s206_s5 = scalar_lea.sflag [#allocation7], %s788_s25  ;;  %s209_s18 = scalar_lea.vmem [#allocation6], %s424_s26 }
  0x39   : > { %622 = dma.done.wait (%p721_p8), %s206_s5, 64  }
  0x3a   : > { %624 = vsyncadd (%p721_p8), %s206_s5, 4294967232  ;;  %v657_v0 = vmov 0.0   ;;  %v242_v1 = vld [vmem:[%s200_s20] sm:$0x3]  ;;  %v427_v2 = vld [vmem:[%s200_s20 + $0x2] sm:$0x3] }
  0x3b   : > { %241 = vst [vmem:[#allocation2] sm:$0x3] %v657_v0  ;;  %v243_v3 = vmax.f32 %v242_v1, 1e-07  ;;  %v247_v4 = vmax.f32 %v427_v2, 1e-07 }
  0x3c   : > { %v249_v9 = vld [vmem:[%s209_s18] sm:$0x3]  ;;  %v428_v12 = vld [vmem:[%s209_s18 + $0x2] sm:$0x3]  ;;  %vm274_vm0 = vcmask 1041408   ;;  %s426_s21 = sshll.u32 %s788_s25, 3 }
  0x3d   : > { %v244_v5 = vmin.f32 %v243_v3, 0.9999999  ;;  %v248_v6 = vmin.f32 %v247_v4, 0.9999999  ;;  %s234_s19 = scalar_lea.vmem [#allocation8], %s426_s21  ;;  %s430_s29 = sshll.u32 %s643_s12, 7 }
  0x3e   : > { %s302_s28 = sshll.u32 %s234_s19, 4  ;;  %s300_s15 = scalar_lea.hbm %s850_s2, %s430_s29  ;;  %s803_s28 = int_to_ptr.vmem [resolvable:$true] %s302_s28 }
  0x3f   : > { %507 = vlog2.f32 %v244_v5  ;;  %v260_v7 = vsub.f32 1.0, %v244_v5  ;;  %v261_v10 = vsub.f32 1.0, %v248_v6  ;;  %s288_s16 = scalar_lea.sflag [#allocation5], %s788_s25  ;;  %s567_s30 = scalar_lea.vmem %s803_s28, 128 }
  0x40   : > { %509 = vlog2.f32 %v248_v6  ;;  %p568_p8 = scmp.ne.s32.totalorder %s803_s28, %s567_s30  ;;  %s658_s4 = smov [#allocation8]  }
  0x41   : > { %v262_v16 = vmul.f32 %v260_v7, %v260_v7  ;;  %v264_v18 = vmul.f32 %v261_v10, %v261_v10  ;;  %s571_s12 = sshll.u32 %s658_s4, 4  ;;  %s572_s12 = int_to_ptr.vmem [resolvable:$false] %s571_s12 }
  0x42   : > { %v267_v23 = vld [vmem:[#allocation2] sm:$0x3]  ;;  %p569_p0 = pnand %p568_p8, %p725_p9  ;;  %s573_s27 = scalar_lea.vmem %s572_s12, 256 }
  0x43   : > { %p574_p5 = scmp.lt.s32.totalorder %s803_s28, %s572_s12  ;;  %p575_p6 = scmp.lt.s32.totalorder %s573_s27, %s567_s30 }
  0x44   : > { %p570_p2 = pneg %p569_p0 }
  0x45   : > { %p576_p4 = por %p575_p6, %p574_p5 }
  0x47   : > { %p577_p7 = pnand %p576_p4, %p570_p2 }
  0x4c   : > { %v508_v8 = vpop.eup %507 }
  0x4d   : > { %v510_v11 = vpop.eup %509  ;;  %v253_v13 = vmul.f32 0.6931472, %v508_v8 }
  0x4e   : > { %v257_v14 = vmul.f32 0.6931472, %v510_v11 }
  0x4f   : > { %v254_v15 = vmul.f32 %v253_v13, %v249_v9 }
  0x50   : > { %v258_v17 = vmul.f32 %v428_v12, %v257_v14 }
  0x51   : > { %v255_v19 = vmul.f32 -0.3, %v254_v15 }
  0x52   : > { %v259_v20 = vmul.f32 -0.7, %v258_v17 }
  0x53   : > { %v263_v21 = vmul.f32 %v262_v16, %v255_v19 }
  0x54   : > { %v265_v22 = vmul.f32 %v264_v18, %v259_v20 }
  0x56   : > { %v266_v24 = vadd.f32 %v265_v22, %v263_v21 }
  0x58   : > { %v268_v25 = vadd.f32 %v267_v23, %v266_v24 }
  0x5a   : > { %269 = vst [vmem:[#allocation2] sm:$0x3] %v268_v25 }
  0x61   : > { %v273_v26 = vld [vmem:[#allocation2] sm:$0x3] }
  0x62   : > { %v275_v27 = vsel %vm274_vm0, %v273_v26, 0.0 }
  0x63   : > { %276 = vadd.xlane.f32.xlu0 %v275_v27 }
  0xec   : > { %v277_v28 = vpop.xlane.xlu0 %276 }
  0xed   : > { %v278_v29 = vrot.slane %v277_v28, 4 }
  0xef   : > { %v279_v30 = vadd.f32 %v278_v29, %v277_v28 }
  0xf1   : > { %v280_v31 = vrot.slane %v279_v30, 2 }
  0xf3   : > { %v281_v32 = vadd.f32 %v280_v31, %v279_v30 }
  0xf5   : > { %v282_v33 = vrot.slane %v281_v32, 1 }
  0xf7   : > { %v283_v34 = vadd.f32 %v282_v33, %v281_v32 }
  0xf9   : > { %435 = vpush %v283_v34 }
 0x12a   : > { %s436_s3 = spop %435 }
 0x12b   : > { %v285_v35 = vstv %s436_s3 }
 0x12c   : > { %286 = vst [vmem:[%s234_s19] sm:$0xff] %v285_v35 }
 0x12d   : > { %580 = shalt.err (!%p577_p7)
}
 0x12e   : > { %s581_s26 = scalar_lea.hbm %s300_s15, 128  ;;  %s585_s20 = scalar_lea.hbm %s850_s2, 256 }
 0x12f   : > { %p582_p10 = scmp.ne.s32.totalorder %s300_s15, %s581_s26  ;;  %p586_p3 = scmp.lt.s32.totalorder %s300_s15, %s850_s2 }
 0x130   : > { %p587_p8 = scmp.lt.s32.totalorder %s585_s20, %s581_s26 }
 0x131   : > { %p583_p1 = pnand %p582_p10, %p725_p9 }
 0x132   : > { %p588_p0 = por %p587_p8, %p586_p3 }
 0x133   : > { %p584_p13 = pneg %p583_p1 }
 0x135   : > { %p589_p12 = pnand %p588_p0, %p584_p13 }
 0x137   : > { %592 = shalt.err (!%p589_p12)
}
 0x138   : > { %441 = dma.vmem_to_hbm [thread:$0]  (%p725_p9), %s803_s28, 128, %s300_s15, %s288_s16  }
 0x139 PF: > { %s314_s21 = sand.u32 1, %s631_s9   ;;  %p857_p2 = scmp.ge.s32.totalorder %s651_s14, 2 }
 0x13a   : > { %s315_s19 = scalar_lea.sflag [#allocation5], %s314_s21 }
 0x13b   : > { %p451_p5 = pnand %p857_p2, %p732_p11 }
 0x13d   : > { %p452_p6 = pneg %p451_p5 }
 0x13f   : > { %626 = dma.done.wait (%p452_p6), %s315_s19, 128  }
 0x140   : > { %628 = vsyncadd (%p452_p6), %s315_s19, 4294967168  ;;  %s21_s14 = sadd.s32 1, %s651_s14   ;;  %s858_s9 = smov %s635_s10 }
 0x141   : > { %p18_p4 = scmp.ge.s32.totalorder %s21_s14, 4   ;;  %s859_s10 = smov %s639_s11 }
 0x142   : > { %s860_s11 = smov %s730_s23  ;;  %s861_s12 = smov %s647_s13 }
 0x143   : > { %s862_s13 = smov %s864_s17  ;;  %20 = sbr.rel (!%p18_p4) target bundleno = 8 (0x8), region = 96 }
 0x148   :  { %320 = vsyncpa [#allocation4], 1 }
 0x149   :  { %322 = vsyncpa [#allocation4 + $0x1], 1 }
 0x14a   :  { %323 = vsyncpa [#allocation7], 1 }
 0x14b   :  { %325 = vsyncpa [#allocation7 + $0x1], 1 }
 0x14c   :  { %326 = vsyncpa [#allocation5], 1 }
 0x14d   :  { %328 = vsyncpa [#allocation5 + $0x1], 1 }

</bundles_post_ra>
